<compile_context>
chip_gen: v5e
topology: v5e:2x2
jax: 0.10.0
libtpu: 0.0.40
codegen_flags: <defaults>
</compile_context>

<pallas_src>
import functools

import jax
import jax.numpy as jnp
from jax.experimental import pallas as pl
from jax.experimental.pallas import tpu as pltpu


_TM_TARGET = 256                     # row tile: >=256 rows feeds the 256-wide MXU
_VMEM_LIMIT = 48 * 1024 * 1024       # safe on v5e/v6e (128 MiB) and v7x (64 MiB)


def _round_up(x, m):
    return pl.cdiv(x, m) * m


# -----------------------------------------------------------------------------
# Pallas kernels
# -----------------------------------------------------------------------------
def _fused_matmul_kernel(*refs, n_mats, has_residual, relu):
    """sum_i (patches_i @ w_i)  + bias  [+ residual]  [-> ReLU], f32 accumulation."""
    o_ref = refs[-1]
    idx = 0
    acc = None
    for _ in range(n_mats):
        p_ref, w_ref = refs[idx], refs[idx + 1]
        idx += 2
        d = jnp.dot(p_ref[...], w_ref[...], preferred_element_type=jnp.float32)
        acc = d if acc is None else acc + d
    acc = acc + refs[idx][...]                      # (1, C) f32 bias, broadcasts
    idx += 1
    if has_residual:
        acc = acc + refs[idx][...].astype(jnp.float32)
        idx += 1
    if relu:
        acc = jnp.maximum(acc, 0.0)
    o_ref[...] = acc.astype(o_ref.dtype)


def _pool_fc_kernel(x_ref, w_ref, b_ref, o_ref):
    # x: (N, H*W, C) bf16 -> adaptive avg pool (1,1) -> (N, C) f32 -> @ (C, ncp) + bias.
    pooled = jnp.mean(x_ref[...].astype(jnp.float32), axis=1)
    out = jnp.dot(pooled, w_ref[...], preferred_element_type=jnp.float32) + b_ref[...]
    o_ref[...] = out.astype(o_ref.dtype)


# -----------------------------------------------------------------------------
# Pallas wrappers
# -----------------------------------------------------------------------------
def fused_matmul(mats, bias, residual=None, relu=True, out_dtype=jnp.bfloat16):
    """Fused conv-as-matmul: sum of (patches @ weight) + bias (+ residual) (+ ReLU).

    mats: list of (patches (M, K_i), weight (K_i, C)) pairs sharing M and C.
    All matmul operands are cast to bf16; accumulation is f32 on the MXU.
    """
    M = mats[0][0].shape[0]
    C = mats[0][1].shape[1]

    TM = min(_TM_TARGET, _round_up(M, 8))
    M_pad = _round_up(M, TM)
    grid = (M_pad // TM,)

    args = []
    in_specs = []
    total_K = 0
    for p, w in mats:
        K = p.shape[1]
        total_K += K
        if p.shape[0] != M_pad:
            p = jnp.pad(p, ((0, M_pad - p.shape[0]), (0, 0)))
        args.append(p.astype(jnp.bfloat16))
        in_specs.append(pl.BlockSpec((TM, K), lambda i: (i, 0)))
        args.append(w.astype(jnp.bfloat16))
        in_specs.append(pl.BlockSpec((K, C), lambda i: (0, 0)))

    args.append(bias.reshape(1, C).astype(jnp.float32))
    in_specs.append(pl.BlockSpec((1, C), lambda i: (0, 0)))

    if residual is not None:
        r = residual
        if r.shape[0] != M_pad:
            r = jnp.pad(r, ((0, M_pad - r.shape[0]), (0, 0)))
        args.append(r.astype(jnp.bfloat16))
        in_specs.append(pl.BlockSpec((TM, C), lambda i: (i, 0)))

    kernel = functools.partial(
        _fused_matmul_kernel,
        n_mats=len(mats),
        has_residual=residual is not None,
        relu=relu,
    )

    flops = 2 * M_pad * total_K * C
    bytes_accessed = sum(int(a.size) * a.dtype.itemsize for a in args)
    bytes_accessed += M_pad * C * jnp.dtype(out_dtype).itemsize

    out = pl.pallas_call(
        kernel,
        out_shape=jax.ShapeDtypeStruct((M_pad, C), out_dtype),
        grid=grid,
        in_specs=in_specs,
        out_specs=pl.BlockSpec((TM, C), lambda i: (i, 0)),
        compiler_params=pltpu.CompilerParams(
            dimension_semantics=("parallel",),
            vmem_limit_bytes=_VMEM_LIMIT,
        ),
        cost_estimate=pl.CostEstimate(
            flops=int(flops), transcendentals=0, bytes_accessed=int(bytes_accessed)),
    )(*args)

    if M_pad != M:
        out = out[:M]
    return out


def pool_fc(x_nhwc, w, b):
    """AdaptiveAvgPool2d((1,1)) + flatten + Linear, fused in one Pallas kernel."""
    N, H, W, C = x_nhwc.shape
    x3 = x_nhwc.reshape(N, H * W, C)
    num_classes = w.shape[1]
    ncp = _round_up(num_classes, 128)                 # lane-dense output (100 -> 128)
    w_pad = jnp.pad(w, ((0, 0), (0, ncp - num_classes))).astype(jnp.float32)
    b_pad = jnp.pad(b, (0, ncp - num_classes)).reshape(1, ncp).astype(jnp.float32)
    out = pl.pallas_call(
        _pool_fc_kernel,
        out_shape=jax.ShapeDtypeStruct((N, ncp), jnp.float32),
        in_specs=[pl.BlockSpec(memory_space=pltpu.MemorySpace.VMEM)] * 3,
        out_specs=pl.BlockSpec(memory_space=pltpu.MemorySpace.VMEM),
        compiler_params=pltpu.CompilerParams(vmem_limit_bytes=_VMEM_LIMIT),
    )(x3, w_pad, b_pad)
    return out[:, :num_classes]


# -----------------------------------------------------------------------------
# JAX glue: im2col, parameter setup, model composition
# -----------------------------------------------------------------------------
def im2col(x_nhwc, kh, kw, stride, pad):
    """Extract conv patches. Returns ((N*Ho*Wo, kh*kw*C), (N, Ho, Wo)).
    Feature ordering is (ki, kj, cin) — matched by torch_conv_w_to_mat."""
    x = jnp.pad(x_nhwc, ((0, 0), (pad, pad), (pad, pad), (0, 0)))
    N, Hp, Wp, C = x.shape
    Ho = (Hp - kh) // stride + 1
    Wo = (Wp - kw) // stride + 1
    cols = []
    for i in range(kh):
        for j in range(kw):
            cols.append(x[:, i:i + Ho * stride:stride, j:j + Wo * stride:stride, :])
    patches = jnp.concatenate(cols, axis=-1)
    return patches.reshape(N * Ho * Wo, kh * kw * C), (N, Ho, Wo)


def torch_conv_w_to_mat(w):
    # PyTorch (Cout, Cin, kh, kw) -> (kh*kw*Cin, Cout), matching im2col ordering.
    Cout, Cin, kh, kw = w.shape
    return jnp.transpose(w, (2, 3, 1, 0)).reshape(kh * kw * Cin, Cout)


def fold_bn(gamma, beta, mean, var, eps=1e-5):
    scale = gamma / jnp.sqrt(var + eps)
    return scale, beta - mean * scale


def bn_init(key, c):
    k1, k2, k3, k4 = jax.random.split(key, 4)
    gamma = 1.0 + 0.1 * jax.random.normal(k1, (c,), jnp.float32)
    beta = 0.1 * jax.random.normal(k2, (c,), jnp.float32)
    mean = 0.1 * jax.random.normal(k3, (c,), jnp.float32)
    var = 1.0 + 0.1 * jnp.abs(jax.random.normal(k4, (c,), jnp.float32))
    return fold_bn(gamma, beta, mean, var)


def conv_bn_init(key, cout, cin, k):
    """Conv weight (He init) with the folded-BN scale absorbed; returns (w_bf16, bias_f32)."""
    kw, kb = jax.random.split(key)
    fan_in = cin * k * k
    w = jax.random.normal(kw, (cout, cin, k, k), jnp.float32) * (2.0 / fan_in) ** 0.5
    w_col = torch_conv_w_to_mat(w)
    scale, bias = bn_init(kb, cout)
    w_folded = (w_col * scale[None, :]).astype(jnp.bfloat16)
    return w_folded, bias.astype(jnp.float32)


def make_params(key, layers=(1, 1, 1, 1), num_classes=100):
    keys = iter(jax.random.split(key, 256))
    params = {}
    params["conv1_w"], params["bn1_b"] = conv_bn_init(next(keys), 64, 3, 3)

    in_c = 64
    stages = []
    for stage_idx, (out_c, n_blocks) in enumerate(zip((64, 128, 256, 512), layers)):
        stage_stride = 1 if stage_idx == 0 else 2
        blocks = []
        for b in range(n_blocks):
            s = stage_stride if b == 0 else 1
            blk = {"stride": s}
            blk["w1"], blk["b1"] = conv_bn_init(next(keys), out_c, in_c, 3)
            blk["w2"], blk["b2"] = conv_bn_init(next(keys), out_c, out_c, 3)
            if s != 1 or in_c != out_c:
                blk["wd"], blk["bd"] = conv_bn_init(next(keys), out_c, in_c, 1)
            in_c = out_c
            blocks.append(blk)
        stages.append(blocks)
    params["stages"] = stages

    fk1, fk2 = jax.random.split(next(keys))
    params["fc_w"] = jax.random.normal(fk1, (512, num_classes), jnp.float32) / (512 ** 0.5)
    params["fc_b"] = 0.01 * jax.random.normal(fk2, (num_classes,), jnp.float32)
    return params


def basic_block_forward(x_nhwc, blk):
    """torchvision BasicBlock: conv3x3-bn-relu, conv3x3-bn, (+downsample), +id, relu."""
    N, H, W, Cin = x_nhwc.shape
    Cout = blk["w1"].shape[1]
    stride = blk["stride"]

    p1, (n, ho, wo) = im2col(x_nhwc, 3, 3, stride, 1)
    h = fused_matmul([(p1, blk["w1"])], blk["b1"], relu=True)
    h_nhwc = h.reshape(n, ho, wo, Cout)

    p2, _ = im2col(h_nhwc, 3, 3, 1, 1)
    if "wd" in blk:
        # Fuse the downsample 1x1 conv + BN into the same pallas_call as conv2.
        pd, _ = im2col(x_nhwc, 1, 1, stride, 0)
        out = fused_matmul([(p2, blk["w2"]), (pd, blk["wd"])],
                           blk["b2"] + blk["bd"], relu=True)
    else:
        identity = x_nhwc.reshape(N * H * W, Cin)
        out = fused_matmul([(p2, blk["w2"])], blk["b2"],
                           residual=identity, relu=True)
    return out.reshape(n, ho, wo, Cout)


def resnet_forward(params, x_nchw):
    # NCHW (PyTorch) -> NHWC bf16 internal layout
    x = jnp.transpose(x_nchw, (0, 2, 3, 1)).astype(jnp.bfloat16)

    # stem: conv1 (3x3, s=1, p=1, no bias) + bn1 + relu
    p, (n, ho, wo) = im2col(x, 3, 3, 1, 1)
    h = fused_matmul([(p, params["conv1_w"])], params["bn1_b"], relu=True)
    x = h.reshape(n, ho, wo, 64)

    # layer1..layer4
    for stage in params["stages"]:
        for blk in stage:
            x = basic_block_forward(x, blk)

    # avgpool -> flatten -> fc
    return pool_fc(x, params["fc_w"], params["fc_b"])


# -----------------------------------------------------------------------------
# Main
# -----------------------------------------------------------------------------
if __name__ == "__main__":
    key = jax.random.PRNGKey(0)
    pkey, xkey = jax.random.split(key)

    params = make_params(pkey, layers=(1, 1, 1, 1), num_classes=100)
    x = jax.random.normal(xkey, (2, 3, 16, 16), jnp.float32)  # NCHW like PyTorch

    out = resnet_forward(params, x)
    out = jax.block_until_ready(out)
    assert out.shape == (2, 100), out.shape
    assert bool(jnp.all(jnp.isfinite(out)))
    print("KERNEL_OK")
</pallas_src>

<mosaic_0001>
module attributes {stable_mosaic.version = 11 : i64} {
  func.func @_fused_matmul_kernel(%arg0: i32, %arg1: memref<256x27xbf16, #tpu.memory_space<vmem>>, %arg2: memref<27x64xbf16, #tpu.memory_space<vmem>>, %arg3: memref<1x64xf32, #tpu.memory_space<vmem>>, %arg4: memref<256x64xbf16, #tpu.memory_space<vmem>>) attributes {dimension_semantics = [#tpu.dimension_semantics<parallel>], iteration_bounds = array<i64: 2>, scalar_prefetch = 0 : i64, scratch_operands = 0 : i64, tpu.core_type = #tpu.core_type<tc>, window_params = [{transform_indices = @transform_0, window_bounds = array<i64: 256, 27>}, {pipeline_mode = #tpu.pipeline_mode<synchronous>, transform_indices = @transform_1, window_bounds = array<i64: 27, 64>}, {pipeline_mode = #tpu.pipeline_mode<synchronous>, transform_indices = @transform_2, window_bounds = array<i64: 1, 64>}, {transform_indices = @transform_3, window_bounds = array<i64: 256, 64>}]} {
    %c0 = arith.constant 0 : index
    %c0_0 = arith.constant 0 : index
    %0 = vector.load %arg1[%c0, %c0_0] : memref<256x27xbf16, #tpu.memory_space<vmem>>, vector<256x27xbf16>
    %c0_1 = arith.constant 0 : index
    %c0_2 = arith.constant 0 : index
    %1 = vector.load %arg2[%c0_1, %c0_2] : memref<27x64xbf16, #tpu.memory_space<vmem>>, vector<27x64xbf16>
    %cst = arith.constant dense<0.000000e+00> : vector<256x64xf32>
    %2 = tpu.matmul %0, %1, %cst {dimension_numbers = #tpu.dot_dimension_numbers<[1], [0], [0], [1], [0, 0, 1, 1], [], []>} : vector<256x27xbf16>, vector<27x64xbf16>, vector<256x64xf32> -> vector<256x64xf32>
    %c0_3 = arith.constant 0 : index
    %c0_4 = arith.constant 0 : index
    %3 = vector.load %arg3[%c0_3, %c0_4] : memref<1x64xf32, #tpu.memory_space<vmem>>, vector<1x64xf32>
    %4 = vector.broadcast %3 : vector<1x64xf32> to vector<256x64xf32>
    %5 = arith.addf %2, %4 : vector<256x64xf32>
    %cst_5 = arith.constant 0.000000e+00 : f32
    %6 = vector.broadcast %cst_5 : f32 to vector<256x64xf32>
    %7 = arith.maximumf %5, %6 : vector<256x64xf32>
    %8 = arith.truncf %7 : vector<256x64xf32> to vector<256x64xbf16>
    %c0_6 = arith.constant 0 : index
    %c0_7 = arith.constant 0 : index
    %9 = vector.load %arg4[%c0_6, %c0_7] : memref<256x64xbf16, #tpu.memory_space<vmem>>, vector<256x64xbf16>
    tpu.vector_store %arg4[%c0_6, %c0_7], %8 {strides = array<i32>} : memref<256x64xbf16, #tpu.memory_space<vmem>>, vector<256x64xbf16>,
    return
  }
  func.func @transform_0(%arg0: i32) -> (i32, i32) {
    %c0_i32 = arith.constant 0 : i32
    %c0_i32_0 = arith.constant 0 : i32
    return %arg0, %c0_i32 : i32, i32
  }
  func.func @transform_1(%arg0: i32) -> (i32, i32) {
    %c0_i32 = arith.constant 0 : i32
    %c0_i32_0 = arith.constant 0 : i32
    %c0_i32_1 = arith.constant 0 : i32
    return %c0_i32, %c0_i32_0 : i32, i32
  }
  func.func @transform_2(%arg0: i32) -> (i32, i32) {
    %c0_i32 = arith.constant 0 : i32
    %c0_i32_0 = arith.constant 0 : i32
    %c0_i32_1 = arith.constant 0 : i32
    return %c0_i32, %c0_i32_0 : i32, i32
  }
  func.func @transform_3(%arg0: i32) -> (i32, i32) {
    %c0_i32 = arith.constant 0 : i32
    %c0_i32_0 = arith.constant 0 : i32
    return %arg0, %c0_i32 : i32, i32
  }
}

</mosaic_0001>

<bundles_post_ra>
// kernel: tpu_custom_call.1
= control target key start
LH: loop header
LB: loop body
LE: loop exit
PB: predicated region body
PF: predicated region fallthrough
CT: control target
= control target key end

     0   :  { %s766_s12 = smov 0   ;;  %s936_s0 = inlined_call_operand.vmem [shape: bf16[512,27], index: 0, kind: input, shape index: {}]   ;;  %s937_s1 = inlined_call_operand.vmem [shape: bf16[27,64], index: 1, kind: input, shape index: {}]   ;;  %s938_s2 = inlined_call_operand.vmem [shape: f32[1,64], index: 2, kind: input, shape index: {}]   ;;  %s939_s3 = inlined_call_operand.vmem [shape: bf16[512,64], index: 3, kind: output, shape index: {}]  }
   0x1 LB: > { %s604_s13 = sadd.s32 4294967295, %s743_s12   ;;  %p608_p0 = scmp.ge.s32.totalorder %s743_s12, 1  ;;  %s743_s12 = sphi %s766_s12, %s13_s12  }
   0x2   : > { %p138_p1 = scmp.lt.s32.totalorder %s743_s12, 3 }
   0x4   : > { %p139_p2 = pnand %p608_p0, %p138_p1 }
   0x5   : > { %s609_s18 = sshll.u32 (!%p139_p2), %s604_s13, 5 }
   0x6   : > { %142 = sbr.rel (%p139_p2) target bundleno = 221 (0xdd), region = 32  ;;  %p163_p3 = scmp.lt.s32.totalorder (!%p139_p2), %s609_s18, 63 }
   0xb   : > { %v683_v0 = vld [vmem:[%s937_s1 + $0x8] sm:$0xf]  ;;  %v720_v1 = vld [vmem:[%s937_s1 + $0x8] sm:$0x30]  ;;  %vm355_vm0 = vcmask 1044480   ;;  %vm356_vm1 = vcmask 1045504  }
   0xc   : > { %v684_v2 = vor.u32 %v720_v1, %v683_v0  ;;  %v745_v3 = vmov 65535   ;;  %s941_s18 = smov (!%p163_p3, %s609_s18), 63  ;;  %v719_v7 = vld [vmem:[%s937_s1] sm:$0xff]  ;;  %vm306_vm2 = vcmask 220160   ;;  %vm515_vm3 = vcmask 519168  }
   0xd   : > { %v357_v4 = vsel %vm355_vm0, 4294967295, %v745_v3  ;;  %s610_s21 = sshll.u32 %s941_s18, 2  ;;  %v828_v24 = vld [vmem:[%s938_s2] ss:$0 sm:$0xff] }
   0xe   : > { %v358_v5 = vsel %vm356_vm1, %v357_v4, 0  ;;  %s791_s24 = scalar_lea.vmem %s936_s0, %s610_s21  ;;  %s837_s29 = scalar_lea.vmem %s939_s3, %s610_s21 }
   0xf   : > { %v360_v6 = vand.u32 %v684_v2, %v358_v5  ;;  %v703_v8 = vld [vmem:[%s791_s24] sm:$0xff]  ;;  %v704_v12 = vld [vmem:[%s791_s24 + $0x8] sm:$0xff]  ;;  %v705_v16 = vld [vmem:[%s791_s24 + $0x10] sm:$0xff] }
  0x10   : > { %v707_v9 = vld [vmem:[%s791_s24 + $0x20] sm:$0xff]  ;;  %v708_v13 = vld [vmem:[%s791_s24 + $0x28] sm:$0xff]  ;;  %v709_v17 = vld [vmem:[%s791_s24 + $0x30] sm:$0xff] }
  0x11   : > { %368 = vmatpush.bf16.msra.mxu0 %v360_v6  ;;  %721 = vmatpush.bf16.msra.mxu1 %v360_v6  ;;  %v711_v10 = vld [vmem:[%s791_s24 + $0x40] sm:$0xff]  ;;  %v712_v14 = vld [vmem:[%s791_s24 + $0x48] sm:$0xff]  ;;  %v713_v18 = vld [vmem:[%s791_s24 + $0x50] sm:$0xff] }
  0x12   : > { %722 = vmatpush.bf16.msra.mxu2 %v360_v6  ;;  %723 = vmatpush.bf16.msra.mxu3 %v360_v6  ;;  %v715_v11 = vld [vmem:[%s791_s24 + $0x60] sm:$0xff]  ;;  %v716_v15 = vld [vmem:[%s791_s24 + $0x68] sm:$0xff]  ;;  %v717_v19 = vld [vmem:[%s791_s24 + $0x70] sm:$0xff] }
  0x13   : > { %v706_v20 = vld [vmem:[%s791_s24 + $0x18] sm:$0xff] }
  0x14   : > { %v710_v21 = vld [vmem:[%s791_s24 + $0x38] sm:$0xff] }
  0x15   : > { %369 = vmatpush.bf16.msra.mxu0 %v719_v7  ;;  %724 = vmatpush.bf16.msra.mxu1 %v719_v7  ;;  %v714_v22 = vld [vmem:[%s791_s24 + $0x58] sm:$0xff] }
  0x16   : > { %725 = vmatpush.bf16.msra.mxu2 %v719_v7  ;;  %726 = vmatpush.bf16.msra.mxu3 %v719_v7  ;;  %v718_v23 = vld [vmem:[%s791_s24 + $0x78] sm:$0xff] }
  0x18   : > { %685 = vmatmul.msk.bf16.vlgmr.msra.gmra.mxu0 %vm306_vm2, %v703_v8  ;;  %689 = vmatmul.msk.bf16.vlgmr.msra.gmra.mxu1 %vm306_vm2, %v707_v9 }
  0x19   : > { %693 = vmatmul.msk.bf16.vlgmr.msra.gmra.mxu2 %vm306_vm2, %v711_v10  ;;  %697 = vmatmul.msk.bf16.vlgmr.msra.gmra.mxu3 %vm306_vm2, %v715_v11 }
  0x28   : > { %686 = vmatmul.msk.bf16.gmra.mxu0 %vm306_vm2, %v704_v12  ;;  %690 = vmatmul.msk.bf16.gmra.mxu1 %vm306_vm2, %v708_v13 }
  0x29   : > { %694 = vmatmul.msk.bf16.gmra.mxu2 %vm306_vm2, %v712_v14  ;;  %698 = vmatmul.msk.bf16.gmra.mxu3 %vm306_vm2, %v716_v15 }
  0x38   : > { %687 = vmatmul.msk.bf16.gmra.mxu0 %vm306_vm2, %v705_v16  ;;  %691 = vmatmul.msk.bf16.gmra.mxu1 %vm306_vm2, %v709_v17 }
  0x39   : > { %695 = vmatmul.msk.bf16.gmra.mxu2 %vm306_vm2, %v713_v18  ;;  %699 = vmatmul.msk.bf16.gmra.mxu3 %vm306_vm2, %v717_v19 }
  0x48   : > { %688 = vmatmul.msk.bf16.gmra.mxu0 %vm306_vm2, %v706_v20  ;;  %692 = vmatmul.msk.bf16.gmra.mxu1 %vm306_vm2, %v710_v21 }
  0x49   : > { %696 = vmatmul.msk.bf16.gmra.mxu2 %vm306_vm2, %v714_v22  ;;  %700 = vmatmul.msk.bf16.gmra.mxu3 %vm306_vm2, %v718_v23 }
  0x95   : > { %v371_v25 = vpop.f32.mrf.mxu0  ;;  %v391_v26 = vpop.f32.mrf.mxu1 }
  0x96   : > { %v372_v27 = vadd.f32 %v828_v24, %v371_v25  ;;  %v392_v28 = vadd.f32 %v828_v24, %v391_v26 }
  0x98   : > { %v451_v29 = vmax.f32 %v372_v27, 0.0  ;;  %v459_v30 = vmax.f32 %v392_v28, 0.0 }
  0x9a   : > { %v483_v31 = vpack.c.bf16 %v451_v29, %v451_v29  ;;  %v491_v32 = vpack.c.bf16 %v459_v30, %v459_v30 }
  0x9c   : > { %516 = vst.msk [vmem:[%s837_s29] sm:$0xf] %vm515_vm3, %v483_v31  ;;  %v411_v33 = vpop.f32.mrf.mxu2  ;;  %v431_v34 = vpop.f32.mrf.mxu3 }
  0x9d   : > { %524 = vst.msk [vmem:[%s837_s29 + $0x20] sm:$0xf] %vm515_vm3, %v491_v32  ;;  %v412_v35 = vadd.f32 %v828_v24, %v411_v33  ;;  %v432_v36 = vadd.f32 %v828_v24, %v431_v34  ;;  %v373_v37 = vpop.f32.mrf.mxu0  ;;  %v393_v38 = vpop.f32.mrf.mxu1 }
  0x9e   : > { %v374_v39 = vadd.f32 %v828_v24, %v373_v37  ;;  %v394_v40 = vadd.f32 %v828_v24, %v393_v38 }
  0x9f   : > { %v467_v41 = vmax.f32 %v412_v35, 0.0  ;;  %v475_v42 = vmax.f32 %v432_v36, 0.0 }
  0xa0   : > { %v452_v43 = vmax.f32 %v374_v39, 0.0  ;;  %v460_v44 = vmax.f32 %v394_v40, 0.0 }
  0xa1   : > { %v499_v45 = vpack.c.bf16 %v467_v41, %v467_v41  ;;  %v507_v46 = vpack.c.bf16 %v475_v42, %v475_v42 }
  0xa2   : > { %v484_v47 = vpack.c.bf16 %v452_v43, %v452_v43  ;;  %v492_v48 = vpack.c.bf16 %v460_v44, %v460_v44 }
  0xa3   : > { %532 = vst.msk [vmem:[%s837_s29 + $0x40] sm:$0xf] %vm515_vm3, %v499_v45 }
  0xa4   : > { %540 = vst.msk [vmem:[%s837_s29 + $0x60] sm:$0xf] %vm515_vm3, %v507_v46  ;;  %v413_v49 = vpop.f32.mrf.mxu2  ;;  %v433_v50 = vpop.f32.mrf.mxu3 }
  0xa5   : > { %517 = vst.msk [vmem:[%s837_s29 + $0x4] sm:$0xf] %vm515_vm3, %v484_v47  ;;  %v414_v51 = vadd.f32 %v828_v24, %v413_v49  ;;  %v434_v52 = vadd.f32 %v828_v24, %v433_v50  ;;  %v376_v53 = vpop.f32.mrf.mxu0  ;;  %v396_v54 = vpop.f32.mrf.mxu1 }
  0xa6   : > { %525 = vst.msk [vmem:[%s837_s29 + $0x24] sm:$0xf] %vm515_vm3, %v492_v48  ;;  %v377_v55 = vadd.f32 %v828_v24, %v376_v53  ;;  %v397_v56 = vadd.f32 %v828_v24, %v396_v54 }
  0xa7   : > { %v468_v57 = vmax.f32 %v414_v51, 0.0  ;;  %v476_v58 = vmax.f32 %v434_v52, 0.0 }
  0xa8   : > { %v453_v59 = vmax.f32 %v377_v55, 0.0  ;;  %v461_v60 = vmax.f32 %v397_v56, 0.0 }
  0xa9   : > { %v500_v61 = vpack.c.bf16 %v468_v57, %v468_v57  ;;  %v508_v62 = vpack.c.bf16 %v476_v58, %v476_v58 }
  0xaa   : > { %v485_v63 = vpack.c.bf16 %v453_v59, %v453_v59  ;;  %v493_v0 = vpack.c.bf16 %v461_v60, %v461_v60 }
  0xab   : > { %533 = vst.msk [vmem:[%s837_s29 + $0x44] sm:$0xf] %vm515_vm3, %v500_v61 }
  0xac   : > { %541 = vst.msk [vmem:[%s837_s29 + $0x64] sm:$0xf] %vm515_vm3, %v508_v62  ;;  %v416_v1 = vpop.f32.mrf.mxu2  ;;  %v436_v2 = vpop.f32.mrf.mxu3 }
  0xad   : > { %518 = vst.msk [vmem:[%s837_s29 + $0x8] sm:$0xf] %vm515_vm3, %v485_v63  ;;  %v417_v3 = vadd.f32 %v828_v24, %v416_v1  ;;  %v437_v4 = vadd.f32 %v828_v24, %v436_v2  ;;  %v378_v5 = vpop.f32.mrf.mxu0  ;;  %v398_v6 = vpop.f32.mrf.mxu1 }
  0xae   : > { %526 = vst.msk [vmem:[%s837_s29 + $0x28] sm:$0xf] %vm515_vm3, %v493_v0  ;;  %v379_v7 = vadd.f32 %v828_v24, %v378_v5  ;;  %v399_v8 = vadd.f32 %v828_v24, %v398_v6 }
  0xaf   : > { %v469_v9 = vmax.f32 %v417_v3, 0.0  ;;  %v477_v10 = vmax.f32 %v437_v4, 0.0 }
  0xb0   : > { %v454_v11 = vmax.f32 %v379_v7, 0.0  ;;  %v462_v12 = vmax.f32 %v399_v8, 0.0 }
  0xb1   : > { %v501_v13 = vpack.c.bf16 %v469_v9, %v469_v9  ;;  %v509_v14 = vpack.c.bf16 %v477_v10, %v477_v10 }
  0xb2   : > { %v486_v15 = vpack.c.bf16 %v454_v11, %v454_v11  ;;  %v494_v16 = vpack.c.bf16 %v462_v12, %v462_v12 }
  0xb3   : > { %534 = vst.msk [vmem:[%s837_s29 + $0x48] sm:$0xf] %vm515_vm3, %v501_v13 }
  0xb4   : > { %542 = vst.msk [vmem:[%s837_s29 + $0x68] sm:$0xf] %vm515_vm3, %v509_v14  ;;  %v418_v17 = vpop.f32.mrf.mxu2  ;;  %v438_v18 = vpop.f32.mrf.mxu3 }
  0xb5   : > { %519 = vst.msk [vmem:[%s837_s29 + $0xc] sm:$0xf] %vm515_vm3, %v486_v15  ;;  %v419_v19 = vadd.f32 %v828_v24, %v418_v17  ;;  %v439_v20 = vadd.f32 %v828_v24, %v438_v18  ;;  %v381_v21 = vpop.f32.mrf.mxu0  ;;  %v401_v22 = vpop.f32.mrf.mxu1 }
  0xb6   : > { %527 = vst.msk [vmem:[%s837_s29 + $0x2c] sm:$0xf] %vm515_vm3, %v494_v16  ;;  %v382_v23 = vadd.f32 %v828_v24, %v381_v21  ;;  %v402_v25 = vadd.f32 %v828_v24, %v401_v22 }
  0xb7   : > { %v470_v26 = vmax.f32 %v419_v19, 0.0  ;;  %v478_v27 = vmax.f32 %v439_v20, 0.0 }
  0xb8   : > { %v455_v28 = vmax.f32 %v382_v23, 0.0  ;;  %v463_v29 = vmax.f32 %v402_v25, 0.0 }
  0xb9   : > { %v502_v30 = vpack.c.bf16 %v470_v26, %v470_v26  ;;  %v510_v31 = vpack.c.bf16 %v478_v27, %v478_v27 }
  0xba   : > { %v487_v32 = vpack.c.bf16 %v455_v28, %v455_v28  ;;  %v495_v33 = vpack.c.bf16 %v463_v29, %v463_v29 }
  0xbb   : > { %535 = vst.msk [vmem:[%s837_s29 + $0x4c] sm:$0xf] %vm515_vm3, %v502_v30 }
  0xbc   : > { %543 = vst.msk [vmem:[%s837_s29 + $0x6c] sm:$0xf] %vm515_vm3, %v510_v31  ;;  %v421_v34 = vpop.f32.mrf.mxu2  ;;  %v441_v35 = vpop.f32.mrf.mxu3 }
  0xbd   : > { %520 = vst.msk [vmem:[%s837_s29 + $0x10] sm:$0xf] %vm515_vm3, %v487_v32  ;;  %v422_v36 = vadd.f32 %v828_v24, %v421_v34  ;;  %v442_v37 = vadd.f32 %v828_v24, %v441_v35  ;;  %v383_v38 = vpop.f32.mrf.mxu0  ;;  %v403_v39 = vpop.f32.mrf.mxu1 }
  0xbe   : > { %528 = vst.msk [vmem:[%s837_s29 + $0x30] sm:$0xf] %vm515_vm3, %v495_v33  ;;  %v384_v40 = vadd.f32 %v828_v24, %v383_v38  ;;  %v404_v41 = vadd.f32 %v828_v24, %v403_v39 }
  0xbf   : > { %v471_v42 = vmax.f32 %v422_v36, 0.0  ;;  %v479_v43 = vmax.f32 %v442_v37, 0.0 }
  0xc0   : > { %v456_v44 = vmax.f32 %v384_v40, 0.0  ;;  %v464_v45 = vmax.f32 %v404_v41, 0.0 }
  0xc1   : > { %v503_v46 = vpack.c.bf16 %v471_v42, %v471_v42  ;;  %v511_v47 = vpack.c.bf16 %v479_v43, %v479_v43 }
  0xc2   : > { %v488_v48 = vpack.c.bf16 %v456_v44, %v456_v44  ;;  %v496_v49 = vpack.c.bf16 %v464_v45, %v464_v45 }
  0xc3   : > { %536 = vst.msk [vmem:[%s837_s29 + $0x50] sm:$0xf] %vm515_vm3, %v503_v46 }
  0xc4   : > { %544 = vst.msk [vmem:[%s837_s29 + $0x70] sm:$0xf] %vm515_vm3, %v511_v47  ;;  %v423_v50 = vpop.f32.mrf.mxu2  ;;  %v443_v51 = vpop.f32.mrf.mxu3 }
  0xc5   : > { %521 = vst.msk [vmem:[%s837_s29 + $0x14] sm:$0xf] %vm515_vm3, %v488_v48  ;;  %v424_v52 = vadd.f32 %v828_v24, %v423_v50  ;;  %v444_v53 = vadd.f32 %v828_v24, %v443_v51  ;;  %v386_v54 = vpop.f32.mrf.mxu0  ;;  %v406_v55 = vpop.f32.mrf.mxu1 }
  0xc6   : > { %529 = vst.msk [vmem:[%s837_s29 + $0x34] sm:$0xf] %vm515_vm3, %v496_v49  ;;  %v387_v56 = vadd.f32 %v828_v24, %v386_v54  ;;  %v407_v57 = vadd.f32 %v828_v24, %v406_v55 }
  0xc7   : > { %v472_v58 = vmax.f32 %v424_v52, 0.0  ;;  %v480_v59 = vmax.f32 %v444_v53, 0.0 }
  0xc8   : > { %v457_v60 = vmax.f32 %v387_v56, 0.0  ;;  %v465_v61 = vmax.f32 %v407_v57, 0.0 }
  0xc9   : > { %v504_v62 = vpack.c.bf16 %v472_v58, %v472_v58  ;;  %v512_v63 = vpack.c.bf16 %v480_v59, %v480_v59 }
  0xca   : > { %v489_v0 = vpack.c.bf16 %v457_v60, %v457_v60  ;;  %v497_v1 = vpack.c.bf16 %v465_v61, %v465_v61 }
  0xcb   : > { %537 = vst.msk [vmem:[%s837_s29 + $0x54] sm:$0xf] %vm515_vm3, %v504_v62 }
  0xcc   : > { %545 = vst.msk [vmem:[%s837_s29 + $0x74] sm:$0xf] %vm515_vm3, %v512_v63  ;;  %v426_v2 = vpop.f32.mrf.mxu2  ;;  %v446_v3 = vpop.f32.mrf.mxu3 }
  0xcd   : > { %522 = vst.msk [vmem:[%s837_s29 + $0x18] sm:$0xf] %vm515_vm3, %v489_v0  ;;  %v427_v4 = vadd.f32 %v828_v24, %v426_v2  ;;  %v447_v5 = vadd.f32 %v828_v24, %v446_v3  ;;  %v388_v6 = vpop.f32.mrf.mxu0  ;;  %v408_v7 = vpop.f32.mrf.mxu1 }
  0xce   : > { %530 = vst.msk [vmem:[%s837_s29 + $0x38] sm:$0xf] %vm515_vm3, %v497_v1  ;;  %v389_v8 = vadd.f32 %v828_v24, %v388_v6  ;;  %v409_v9 = vadd.f32 %v828_v24, %v408_v7 }
  0xcf   : > { %v473_v10 = vmax.f32 %v427_v4, 0.0  ;;  %v481_v11 = vmax.f32 %v447_v5, 0.0 }
  0xd0   : > { %v458_v12 = vmax.f32 %v389_v8, 0.0  ;;  %v466_v13 = vmax.f32 %v409_v9, 0.0 }
  0xd1   : > { %v505_v14 = vpack.c.bf16 %v473_v10, %v473_v10  ;;  %v513_v15 = vpack.c.bf16 %v481_v11, %v481_v11 }
  0xd2   : > { %v490_v16 = vpack.c.bf16 %v458_v12, %v458_v12  ;;  %v498_v17 = vpack.c.bf16 %v466_v13, %v466_v13 }
  0xd3   : > { %538 = vst.msk [vmem:[%s837_s29 + $0x58] sm:$0xf] %vm515_vm3, %v505_v14 }
  0xd4   : > { %546 = vst.msk [vmem:[%s837_s29 + $0x78] sm:$0xf] %vm515_vm3, %v513_v15  ;;  %v428_v18 = vpop.f32.mrf.mxu2  ;;  %v448_v19 = vpop.f32.mrf.mxu3 }
  0xd5   : > { %523 = vst.msk [vmem:[%s837_s29 + $0x1c] sm:$0xf] %vm515_vm3, %v490_v16  ;;  %v429_v20 = vadd.f32 %v828_v24, %v428_v18  ;;  %v449_v21 = vadd.f32 %v828_v24, %v448_v19 }
  0xd6   : > { %531 = vst.msk [vmem:[%s837_s29 + $0x3c] sm:$0xf] %vm515_vm3, %v498_v17 }
  0xd7   : > { %v474_v22 = vmax.f32 %v429_v20, 0.0  ;;  %v482_v23 = vmax.f32 %v449_v21, 0.0 }
  0xd9   : > { %v506_v25 = vpack.c.bf16 %v474_v22, %v474_v22  ;;  %v514_v26 = vpack.c.bf16 %v482_v23, %v482_v23 }
  0xdb   : > { %539 = vst.msk [vmem:[%s837_s29 + $0x5c] sm:$0xf] %vm515_vm3, %v506_v25 }
  0xdc   : > { %547 = vst.msk [vmem:[%s837_s29 + $0x7c] sm:$0xf] %vm515_vm3, %v514_v26 }
  0xdd PF: > { %s13_s12 = sadd.s32 1, %s743_s12  }
  0xde   : > { %p10_p4 = scmp.ge.s32.totalorder %s13_s12, 4  }
  0xe0   :  { %12 = sbr.rel (!%p10_p4) target bundleno = 1 (0x1), region = 62 }

</bundles_post_ra>
